<compile_context>
chip_gen: v7x
topology: tpu7x:2x2x1
jax: 0.10.0
libtpu: 0.0.40
codegen_flags: <defaults>
</compile_context>

<pallas_src>
import math
from functools import partial

import jax
import jax.numpy as jnp
from jax.experimental import pallas as pl
from jax.experimental.pallas import tpu as pltpu


def _cross_attn_kernel(qin_ref, inp_ref,
                       wq_ref, wkv_ref, bq_ref, bkv_ref,
                       wo_ref, bo_ref,
                       out_ref, *, num_heads, head_dim):
    """Fused projections + multi-head attention + out_proj for one batch chunk.

    Refs arrive in the native PyTorch (seq, batch, embed) layout:
      qin_ref: (Lq, B, E)   inp_ref: (Lk, B, E)   out_ref: (Lq, B, E)
    """
    Lq, B, E = qin_ref.shape
    Lk = inp_ref.shape[0]
    Rq, Rk = Lq * B, Lk * B

    # Flatten (seq, batch) rows for the projection GEMMs.  Merging leading
    # dims (lane dim untouched) is a cheap reshape; row order is irrelevant to
    # a row-wise GEMM.  Row r corresponds to (seq = r // B, batch = r % B).
    qin = qin_ref[...].reshape(Rq, E)
    inp = inp_ref[...].reshape(Rk, E)

    # Fused projections.  Weights are pre-transposed to (in, out); the
    # 1/sqrt(head_dim) attention scale is already folded into wq/bq; K and V
    # share one lane-dense (E, 2E) GEMM.
    q = jnp.dot(qin, wq_ref[...], preferred_element_type=jnp.float32) + bq_ref[...]
    kv = jnp.dot(inp, wkv_ref[...], preferred_element_type=jnp.float32) + bkv_ref[...]
    k = kv[:, :E]
    v = kv[:, E:]

    # Block-diagonal additive mask keeping attention within each batch element
    # while the score matmul runs over the flattened (seq*batch) rows.
    # exp(-1e30 - rowmax) underflows to exactly 0.0, so this reproduces the
    # per-batch softmax exactly.  Skipped entirely when B == 1.
    if B > 1:
        row_b = jax.lax.broadcasted_iota(jnp.int32, (Rq, Rk), 0) % B
        col_b = jax.lax.broadcasted_iota(jnp.int32, (Rq, Rk), 1) % B
        neg_bias = jnp.where(row_b == col_b, 0.0, -1e30).astype(jnp.float32)
    else:
        neg_bias = None

    # Per-head attention.  Heads stay a tiny statically-unrolled loop with
    # static lane slices: merging them into one batched einsum would need
    # lane-splitting reshapes ((.., E) -> (.., H, hd)) which relayout poorly
    # at E=32.  Everything below is plain 2D MXU/VPU/XLU work.
    head_outs = []
    for h in range(num_heads):
        s, e = h * head_dim, (h + 1) * head_dim
        qh = q[:, s:e]                               # (Rq, hd), already scaled
        kh = k[:, s:e]                               # (Rk, hd)
        vh = v[:, s:e]                               # (Rk, hd)
        scores = jax.lax.dot_general(                # (Rq, Rk) == qh @ kh.T
            qh, kh, (((1,), (1,)), ((), ())),
            preferred_element_type=jnp.float32)
        if neg_bias is not None:
            scores = scores + neg_bias
        scores = scores - jnp.max(scores, axis=-1, keepdims=True)
        p = jnp.exp(scores)
        denom = jnp.sum(p, axis=-1, keepdims=True)   # (Rq, 1), > 0
        o = jnp.dot(p, vh, preferred_element_type=jnp.float32)   # (Rq, hd)
        head_outs.append(o / denom)                  # exact f32 normalisation
    attn = jnp.concatenate(head_outs, axis=-1)       # (Rq, E)

    # out_proj (weight pre-transposed).  Rows are already in (seq, batch)
    # order, so the store goes straight back to the (Lq, B, E) layout.
    out = jnp.dot(attn, wo_ref[...], preferred_element_type=jnp.float32) + bo_ref[...]
    out_ref[...] = out.reshape(Lq, B, E).astype(out_ref.dtype)


def prepare_cross_attention_params(params, *, num_heads=4):
    """One-off host-side weight fusion.

    Call once per parameter set (outside the per-step path) — under jit with
    traced params these small GEMMs would otherwise re-run every step and can
    cost more than the attention kernel itself.
    """
    wq0, wk0, wv0, w_in, b_in, wo, bo = params
    E = wq0.shape[0]
    assert E % num_heads == 0
    head_dim = E // num_heads
    scale = 1.0 / math.sqrt(head_dim)

    # Outer Linear layers folded into the MHA in_proj; pre-transposed to
    # (in, out); attention scale folded into the Q weight/bias; K|V concat.
    wq_t = ((w_in[:E] @ wq0).T * scale).astype(jnp.float32)             # (E, E)
    wk_t = (w_in[E:2 * E] @ wk0).T                                      # (E, E)
    wv_t = (w_in[2 * E:] @ wv0).T                                       # (E, E)
    wkv_t = jnp.concatenate([wk_t, wv_t], axis=1).astype(jnp.float32)   # (E, 2E)
    bq = (b_in[:E] * scale).reshape(1, E).astype(jnp.float32)
    bkv = b_in[E:].reshape(1, 2 * E).astype(jnp.float32)
    wo_t = wo.T.astype(jnp.float32)                                     # (E, E)
    bo2 = bo.reshape(1, E).astype(jnp.float32)
    # NOTE: bf16 MXU operands (keeping preferred_element_type=f32) are a free
    # scaling knob for larger E/L; kept f32 here for bit-tight accuracy.
    return (wq_t, wkv_t, bq, bkv, wo_t, bo2)


def cross_attention(Q_in, inputs, fused_params, *, num_heads=4,
                    num_batch_chunks=None):
    """Q_in: (Lq, N, E), inputs: (Lk, N, E) -> (Lq, N, E).

    `fused_params` comes from prepare_cross_attention_params().  The kernel
    consumes/produces the native (seq, batch, embed) layout — no HBM
    transposes on either side.
    """
    Lq, N, E = Q_in.shape
    Lk = inputs.shape[0]
    assert E % num_heads == 0
    head_dim = E // num_heads

    # Grid strategy: a single grid step by default (per-step overhead plus
    # weight re-staging dwarfs the compute at small sizes, and a plain
    # "parallel" axis does not shard across v7x TensorCores anyway).  Chunk
    # the batch only to bound the O((B*L)^2) block-diagonal score matrix when
    # N is large, keeping B sublane-aligned (multiple of 8).
    if num_batch_chunks is None:
        num_batch_chunks = N // 8 if (N > 8 and N % 8 == 0) else 1
    assert N % num_batch_chunks == 0
    B = N // num_batch_chunks
    assert B == N or B % 8 == 0, "chunked batch blocks must be sublane-aligned"

    wq_t, wkv_t, bq, bkv, wo_t, bo2 = fused_params

    full = lambda shape: pl.BlockSpec(shape, lambda c: (0,) * len(shape))

    # NOTE: for genuine cross-TensorCore sharding on v7x, the chunked axis
    # should use pltpu.CORE_PARALLEL (or pl.core_map) once per-chunk work is
    # substantial (B*Lq >= 512 rows); plain PARALLEL has no measured effect.
    sem = pltpu.PARALLEL if num_batch_chunks > 1 else pltpu.ARBITRARY

    out = pl.pallas_call(
        partial(_cross_attn_kernel, num_heads=num_heads, head_dim=head_dim),
        out_shape=jax.ShapeDtypeStruct((Lq, N, E), Q_in.dtype),
        grid=(num_batch_chunks,),
        in_specs=[
            pl.BlockSpec((Lq, B, E), lambda c: (0, c, 0)),   # Q_in batch chunk
            pl.BlockSpec((Lk, B, E), lambda c: (0, c, 0)),   # inputs batch chunk
            full((E, E)),          # fused+scaled Q weight (E, E)
            full((E, 2 * E)),      # fused K|V weight (E, 2E)
            full((1, E)),          # scaled Q bias
            full((1, 2 * E)),      # K|V bias
            full((E, E)),          # out_proj weight^T
            full((1, E)),          # out_proj bias
        ],
        out_specs=pl.BlockSpec((Lq, B, E), lambda c: (0, c, 0)),
        compiler_params=pltpu.CompilerParams(dimension_semantics=(sem,)),
    )(Q_in, inputs, wq_t, wkv_t, bq, bkv, wo_t, bo2)

    return out


def cross_attention_ref(Q_in, inputs, params, *, num_heads=4):
    """Pure-JAX reference mirroring torch.nn.MultiheadAttention semantics."""
    wq0, wk0, wv0, w_in, b_in, wo, bo = params
    Lq, N, E = Q_in.shape
    Lk = inputs.shape[0]
    hd = E // num_heads

    Q = Q_in @ wq0.T
    K = inputs @ wk0.T
    V = inputs @ wv0.T
    q = Q @ w_in[:E].T + b_in[:E]
    k = K @ w_in[E:2 * E].T + b_in[E:2 * E]
    v = V @ w_in[2 * E:].T + b_in[2 * E:]

    # (L, N, E) -> (N, H, L, hd)
    def to_heads(x, L):
        return jnp.transpose(x.reshape(L, N, num_heads, hd), (1, 2, 0, 3))

    qh = to_heads(q, Lq) / math.sqrt(hd)
    kh = to_heads(k, Lk)
    vh = to_heads(v, Lk)
    scores = jnp.einsum("nhqd,nhkd->nhqk", qh, kh)
    p = jax.nn.softmax(scores, axis=-1)
    o = jnp.einsum("nhqk,nhkd->nhqd", p, vh)            # (N, H, Lq, hd)
    o = jnp.transpose(o, (2, 0, 1, 3)).reshape(Lq, N, E)
    return o @ wo.T + bo


def init_params(key, hidden_dim):
    ks = jax.random.split(key, 7)
    s = 0.1
    wq0 = s * jax.random.normal(ks[0], (hidden_dim, hidden_dim), jnp.float32)
    wk0 = s * jax.random.normal(ks[1], (hidden_dim, hidden_dim), jnp.float32)
    wv0 = s * jax.random.normal(ks[2], (hidden_dim, hidden_dim), jnp.float32)
    w_in = s * jax.random.normal(ks[3], (3 * hidden_dim, hidden_dim), jnp.float32)
    b_in = s * jax.random.normal(ks[4], (3 * hidden_dim,), jnp.float32)
    wo = s * jax.random.normal(ks[5], (hidden_dim, hidden_dim), jnp.float32)
    bo = s * jax.random.normal(ks[6], (hidden_dim,), jnp.float32)
    return (wq0, wk0, wv0, w_in, b_in, wo, bo)


if __name__ == "__main__":
    hidden_dim = 32   # must be divisible by num_heads=4
    Lq, Lk, N = 8, 8, 2

    key = jax.random.PRNGKey(0)
    k_in, k_q, k_p = jax.random.split(key, 3)
    inputs = jax.random.normal(k_in, (Lk, N, hidden_dim), jnp.float32)
    Q_in = jax.random.normal(k_q, (Lq, N, hidden_dim), jnp.float32)
    params = init_params(k_p, hidden_dim)

    # Hoisted one-off weight fusion (done once per parameter set, reused by
    # every subsequent forward call).
    fused = prepare_cross_attention_params(params, num_heads=4)

    out = cross_attention(Q_in, inputs, fused, num_heads=4)
    out = jax.block_until_ready(out)

    ref = cross_attention_ref(Q_in, inputs, params, num_heads=4)
    assert out.shape == (Lq, N, hidden_dim)
    # Exact f32 softmax normalisation now; remaining differences are only the
    # rounding of the host-side weight fusion, so the tolerance is tight.
    assert jnp.allclose(out, ref, atol=1e-4, rtol=1e-4), "mismatch vs reference"

    print("KERNEL_OK")
</pallas_src>

<mosaic_0001>
module attributes {stable_mosaic.version = 11 : i64} {
  func.func @_cross_attn_kernel(%arg0: i32, %arg1: memref<8x2x32xf32, #tpu.memory_space<vmem>>, %arg2: memref<8x2x32xf32, #tpu.memory_space<vmem>>, %arg3: memref<32x32xf32, #tpu.memory_space<vmem>>, %arg4: memref<32x64xf32, #tpu.memory_space<vmem>>, %arg5: memref<1x32xf32, #tpu.memory_space<vmem>>, %arg6: memref<1x64xf32, #tpu.memory_space<vmem>>, %arg7: memref<32x32xf32, #tpu.memory_space<vmem>>, %arg8: memref<1x32xf32, #tpu.memory_space<vmem>>, %arg9: memref<8x2x32xf32, #tpu.memory_space<vmem>>) attributes {dimension_semantics = [#tpu.dimension_semantics<arbitrary>], iteration_bounds = array<i64: 1>, scalar_prefetch = 0 : i64, scratch_operands = 0 : i64, tpu.core_type = #tpu.core_type<tc>, window_params = [{transform_indices = @transform_0, window_bounds = array<i64: 8, 2, 32>}, {transform_indices = @transform_1, window_bounds = array<i64: 8, 2, 32>}, {pipeline_mode = #tpu.pipeline_mode<synchronous>, transform_indices = @transform_2, window_bounds = array<i64: 32, 32>}, {pipeline_mode = #tpu.pipeline_mode<synchronous>, transform_indices = @transform_3, window_bounds = array<i64: 32, 64>}, {pipeline_mode = #tpu.pipeline_mode<synchronous>, transform_indices = @transform_4, window_bounds = array<i64: 1, 32>}, {pipeline_mode = #tpu.pipeline_mode<synchronous>, transform_indices = @transform_5, window_bounds = array<i64: 1, 64>}, {pipeline_mode = #tpu.pipeline_mode<synchronous>, transform_indices = @transform_6, window_bounds = array<i64: 32, 32>}, {pipeline_mode = #tpu.pipeline_mode<synchronous>, transform_indices = @transform_7, window_bounds = array<i64: 1, 32>}, {transform_indices = @transform_8, window_bounds = array<i64: 8, 2, 32>}]} {
    %c0 = arith.constant 0 : index
    %c0_0 = arith.constant 0 : index
    %c0_1 = arith.constant 0 : index
    %0 = vector.load %arg1[%c0, %c0_0, %c0_1] : memref<8x2x32xf32, #tpu.memory_space<vmem>>, vector<8x2x32xf32>
    %1 = vector.shape_cast %0 : vector<8x2x32xf32> to vector<16x32xf32>
    %c0_2 = arith.constant 0 : index
    %c0_3 = arith.constant 0 : index
    %c0_4 = arith.constant 0 : index
    %2 = vector.load %arg2[%c0_2, %c0_3, %c0_4] : memref<8x2x32xf32, #tpu.memory_space<vmem>>, vector<8x2x32xf32>
    %3 = vector.shape_cast %2 : vector<8x2x32xf32> to vector<16x32xf32>
    %c0_5 = arith.constant 0 : index
    %c0_6 = arith.constant 0 : index
    %4 = vector.load %arg3[%c0_5, %c0_6] : memref<32x32xf32, #tpu.memory_space<vmem>>, vector<32x32xf32>
    %cst = arith.constant dense<0.000000e+00> : vector<16x32xf32>
    %5 = tpu.matmul %1, %4, %cst {dimension_numbers = #tpu.dot_dimension_numbers<[1], [0], [0], [1], [0, 0, 1, 1], [], []>} : vector<16x32xf32>, vector<32x32xf32>, vector<16x32xf32> -> vector<16x32xf32>
    %c0_7 = arith.constant 0 : index
    %c0_8 = arith.constant 0 : index
    %6 = vector.load %arg5[%c0_7, %c0_8] : memref<1x32xf32, #tpu.memory_space<vmem>>, vector<1x32xf32>
    %7 = vector.broadcast %6 : vector<1x32xf32> to vector<16x32xf32>
    %8 = arith.addf %5, %7 : vector<16x32xf32>
    %c0_9 = arith.constant 0 : index
    %c0_10 = arith.constant 0 : index
    %9 = vector.load %arg4[%c0_9, %c0_10] : memref<32x64xf32, #tpu.memory_space<vmem>>, vector<32x64xf32>
    %cst_11 = arith.constant dense<0.000000e+00> : vector<16x64xf32>
    %10 = tpu.matmul %3, %9, %cst_11 {dimension_numbers = #tpu.dot_dimension_numbers<[1], [0], [0], [1], [0, 0, 1, 1], [], []>} : vector<16x32xf32>, vector<32x64xf32>, vector<16x64xf32> -> vector<16x64xf32>
    %c0_12 = arith.constant 0 : index
    %c0_13 = arith.constant 0 : index
    %11 = vector.load %arg6[%c0_12, %c0_13] : memref<1x64xf32, #tpu.memory_space<vmem>>, vector<1x64xf32>
    %12 = vector.broadcast %11 : vector<1x64xf32> to vector<16x64xf32>
    %13 = arith.addf %10, %12 : vector<16x64xf32>
    %14 = vector.extract_strided_slice %13 {offsets = [0, 0], sizes = [16, 32], strides = [1, 1]} : vector<16x64xf32> to vector<16x32xf32>
    %15 = vector.extract_strided_slice %13 {offsets = [0, 32], sizes = [16, 32], strides = [1, 1]} : vector<16x64xf32> to vector<16x32xf32>
    %16 = tpu.iota {dimensions = array<i32: 0>} : vector<16x16xi32>
    %c2_i32 = arith.constant 2 : i32
    %c0_i32 = arith.constant 0 : i32
    %17 = arith.cmpi eq, %c2_i32, %c0_i32 : i32
    %c1_i32 = arith.constant 1 : i32
    %18 = arith.select %17, %c1_i32, %c2_i32 : i32
    %19 = vector.broadcast %18 : i32 to vector<16x16xi32>
    %20 = arith.remsi %16, %19 : vector<16x16xi32>
    %c0_i32_14 = arith.constant 0 : i32
    %21 = vector.broadcast %c0_i32_14 : i32 to vector<16x16xi32>
    %22 = arith.cmpi ne, %20, %21 : vector<16x16xi32>
    %c0_i32_15 = arith.constant 0 : i32
    %23 = vector.broadcast %c0_i32_15 : i32 to vector<16x16xi32>
    %24 = arith.cmpi slt, %20, %23 : vector<16x16xi32>
    %c0_i32_16 = arith.constant 0 : i32
    %25 = arith.cmpi slt, %18, %c0_i32_16 : i32
    %26 = vector.broadcast %25 : i1 to vector<16x16xi1>
    %27 = vector.broadcast %26 : vector<16x16xi1> to vector<16x16xi1>
    %28 = arith.xori %24, %27 : vector<16x16xi1>
    %29 = arith.andi %28, %22 : vector<16x16xi1>
    %30 = vector.broadcast %18 : i32 to vector<16x16xi32>
    %31 = arith.addi %20, %30 : vector<16x16xi32>
    %32 = arith.select %29, %31, %20 : vector<16x16xi1>, vector<16x16xi32>
    %33 = tpu.iota {dimensions = array<i32: 1>} : vector<16x16xi32>
    %c2_i32_17 = arith.constant 2 : i32
    %c0_i32_18 = arith.constant 0 : i32
    %34 = arith.cmpi eq, %c2_i32_17, %c0_i32_18 : i32
    %c1_i32_19 = arith.constant 1 : i32
    %35 = arith.select %34, %c1_i32_19, %c2_i32_17 : i32
    %36 = vector.broadcast %35 : i32 to vector<16x16xi32>
    %37 = arith.remsi %33, %36 : vector<16x16xi32>
    %c0_i32_20 = arith.constant 0 : i32
    %38 = vector.broadcast %c0_i32_20 : i32 to vector<16x16xi32>
    %39 = arith.cmpi ne, %37, %38 : vector<16x16xi32>
    %c0_i32_21 = arith.constant 0 : i32
    %40 = vector.broadcast %c0_i32_21 : i32 to vector<16x16xi32>
    %41 = arith.cmpi slt, %37, %40 : vector<16x16xi32>
    %c0_i32_22 = arith.constant 0 : i32
    %42 = arith.cmpi slt, %35, %c0_i32_22 : i32
    %43 = vector.broadcast %42 : i1 to vector<16x16xi1>
    %44 = vector.broadcast %43 : vector<16x16xi1> to vector<16x16xi1>
    %45 = arith.xori %41, %44 : vector<16x16xi1>
    %46 = arith.andi %45, %39 : vector<16x16xi1>
    %47 = vector.broadcast %35 : i32 to vector<16x16xi32>
    %48 = arith.addi %37, %47 : vector<16x16xi32>
    %49 = arith.select %46, %48, %37 : vector<16x16xi1>, vector<16x16xi32>
    %50 = arith.cmpi eq, %32, %49 : vector<16x16xi32>
    %cst_23 = arith.constant 0.000000e+00 : f32
    %cst_24 = arith.constant -1.000000e+30 : f32
    %51 = vector.broadcast %cst_23 : f32 to vector<16x16xf32>
    %52 = vector.broadcast %cst_24 : f32 to vector<16x16xf32>
    %53 = arith.select %50, %51, %52 : vector<16x16xi1>, vector<16x16xf32>
    %54 = vector.extract_strided_slice %8 {offsets = [0, 0], sizes = [16, 8], strides = [1, 1]} : vector<16x32xf32> to vector<16x8xf32>
    %55 = vector.extract_strided_slice %14 {offsets = [0, 0], sizes = [16, 8], strides = [1, 1]} : vector<16x32xf32> to vector<16x8xf32>
    %56 = vector.extract_strided_slice %15 {offsets = [0, 0], sizes = [16, 8], strides = [1, 1]} : vector<16x32xf32> to vector<16x8xf32>
    %cst_25 = arith.constant dense<0.000000e+00> : vector<16x16xf32>
    %57 = tpu.matmul %54, %55, %cst_25 {dimension_numbers = #tpu.dot_dimension_numbers<[1], [1], [0], [0], [0, 0, 1, 0], [], []>} : vector<16x8xf32>, vector<16x8xf32>, vector<16x16xf32> -> vector<16x16xf32>
    %58 = arith.addf %57, %53 : vector<16x16xf32>
    %cst_26 = arith.constant dense<0xFF800000> : vector<16xf32>
    %59 = vector.multi_reduction <maximumf>, %58, %cst_26 [1] : vector<16x16xf32> to vector<16xf32>
    %60 = vector.shape_cast %59 : vector<16xf32> to vector<16x1xf32>
    %61 = vector.broadcast %60 : vector<16x1xf32> to vector<16x16xf32>
    %62 = arith.subf %58, %61 : vector<16x16xf32>
    %63 = math.exp %62 : vector<16x16xf32>
    %cst_27 = arith.constant dense<0.000000e+00> : vector<16xf32>
    %64 = vector.multi_reduction <add>, %63, %cst_27 [1] : vector<16x16xf32> to vector<16xf32>
    %65 = vector.shape_cast %64 : vector<16xf32> to vector<16x1xf32>
    %cst_28 = arith.constant dense<0.000000e+00> : vector<16x8xf32>
    %66 = tpu.matmul %63, %56, %cst_28 {dimension_numbers = #tpu.dot_dimension_numbers<[1], [0], [0], [1], [0, 0, 1, 1], [], []>} : vector<16x16xf32>, vector<16x8xf32>, vector<16x8xf32> -> vector<16x8xf32>
    %67 = vector.broadcast %65 : vector<16x1xf32> to vector<16x8xf32>
    %68 = arith.divf %66, %67 : vector<16x8xf32>
    %69 = vector.extract_strided_slice %8 {offsets = [0, 8], sizes = [16, 8], strides = [1, 1]} : vector<16x32xf32> to vector<16x8xf32>
    %70 = vector.extract_strided_slice %14 {offsets = [0, 8], sizes = [16, 8], strides = [1, 1]} : vector<16x32xf32> to vector<16x8xf32>
    %71 = vector.extract_strided_slice %15 {offsets = [0, 8], sizes = [16, 8], strides = [1, 1]} : vector<16x32xf32> to vector<16x8xf32>
    %cst_29 = arith.constant dense<0.000000e+00> : vector<16x16xf32>
    %72 = tpu.matmul %69, %70, %cst_29 {dimension_numbers = #tpu.dot_dimension_numbers<[1], [1], [0], [0], [0, 0, 1, 0], [], []>} : vector<16x8xf32>, vector<16x8xf32>, vector<16x16xf32> -> vector<16x16xf32>
    %73 = arith.addf %72, %53 : vector<16x16xf32>
    %cst_30 = arith.constant dense<0xFF800000> : vector<16xf32>
    %74 = vector.multi_reduction <maximumf>, %73, %cst_30 [1] : vector<16x16xf32> to vector<16xf32>
    %75 = vector.shape_cast %74 : vector<16xf32> to vector<16x1xf32>
    %76 = vector.broadcast %75 : vector<16x1xf32> to vector<16x16xf32>
    %77 = arith.subf %73, %76 : vector<16x16xf32>
    %78 = math.exp %77 : vector<16x16xf32>
    %cst_31 = arith.constant dense<0.000000e+00> : vector<16xf32>
    %79 = vector.multi_reduction <add>, %78, %cst_31 [1] : vector<16x16xf32> to vector<16xf32>
    %80 = vector.shape_cast %79 : vector<16xf32> to vector<16x1xf32>
    %cst_32 = arith.constant dense<0.000000e+00> : vector<16x8xf32>
    %81 = tpu.matmul %78, %71, %cst_32 {dimension_numbers = #tpu.dot_dimension_numbers<[1], [0], [0], [1], [0, 0, 1, 1], [], []>} : vector<16x16xf32>, vector<16x8xf32>, vector<16x8xf32> -> vector<16x8xf32>
    %82 = vector.broadcast %80 : vector<16x1xf32> to vector<16x8xf32>
    %83 = arith.divf %81, %82 : vector<16x8xf32>
    %84 = vector.extract_strided_slice %8 {offsets = [0, 16], sizes = [16, 8], strides = [1, 1]} : vector<16x32xf32> to vector<16x8xf32>
    %85 = vector.extract_strided_slice %14 {offsets = [0, 16], sizes = [16, 8], strides = [1, 1]} : vector<16x32xf32> to vector<16x8xf32>
    %86 = vector.extract_strided_slice %15 {offsets = [0, 16], sizes = [16, 8], strides = [1, 1]} : vector<16x32xf32> to vector<16x8xf32>
    %cst_33 = arith.constant dense<0.000000e+00> : vector<16x16xf32>
    %87 = tpu.matmul %84, %85, %cst_33 {dimension_numbers = #tpu.dot_dimension_numbers<[1], [1], [0], [0], [0, 0, 1, 0], [], []>} : vector<16x8xf32>, vector<16x8xf32>, vector<16x16xf32> -> vector<16x16xf32>
    %88 = arith.addf %87, %53 : vector<16x16xf32>
    %cst_34 = arith.constant dense<0xFF800000> : vector<16xf32>
    %89 = vector.multi_reduction <maximumf>, %88, %cst_34 [1] : vector<16x16xf32> to vector<16xf32>
    %90 = vector.shape_cast %89 : vector<16xf32> to vector<16x1xf32>
    %91 = vector.broadcast %90 : vector<16x1xf32> to vector<16x16xf32>
    %92 = arith.subf %88, %91 : vector<16x16xf32>
    %93 = math.exp %92 : vector<16x16xf32>
    %cst_35 = arith.constant dense<0.000000e+00> : vector<16xf32>
    %94 = vector.multi_reduction <add>, %93, %cst_35 [1] : vector<16x16xf32> to vector<16xf32>
    %95 = vector.shape_cast %94 : vector<16xf32> to vector<16x1xf32>
    %cst_36 = arith.constant dense<0.000000e+00> : vector<16x8xf32>
    %96 = tpu.matmul %93, %86, %cst_36 {dimension_numbers = #tpu.dot_dimension_numbers<[1], [0], [0], [1], [0, 0, 1, 1], [], []>} : vector<16x16xf32>, vector<16x8xf32>, vector<16x8xf32> -> vector<16x8xf32>
    %97 = vector.broadcast %95 : vector<16x1xf32> to vector<16x8xf32>
    %98 = arith.divf %96, %97 : vector<16x8xf32>
    %99 = vector.extract_strided_slice %8 {offsets = [0, 24], sizes = [16, 8], strides = [1, 1]} : vector<16x32xf32> to vector<16x8xf32>
    %100 = vector.extract_strided_slice %14 {offsets = [0, 24], sizes = [16, 8], strides = [1, 1]} : vector<16x32xf32> to vector<16x8xf32>
    %101 = vector.extract_strided_slice %15 {offsets = [0, 24], sizes = [16, 8], strides = [1, 1]} : vector<16x32xf32> to vector<16x8xf32>
    %cst_37 = arith.constant dense<0.000000e+00> : vector<16x16xf32>
    %102 = tpu.matmul %99, %100, %cst_37 {dimension_numbers = #tpu.dot_dimension_numbers<[1], [1], [0], [0], [0, 0, 1, 0], [], []>} : vector<16x8xf32>, vector<16x8xf32>, vector<16x16xf32> -> vector<16x16xf32>
    %103 = arith.addf %102, %53 : vector<16x16xf32>
    %cst_38 = arith.constant dense<0xFF800000> : vector<16xf32>
    %104 = vector.multi_reduction <maximumf>, %103, %cst_38 [1] : vector<16x16xf32> to vector<16xf32>
    %105 = vector.shape_cast %104 : vector<16xf32> to vector<16x1xf32>
    %106 = vector.broadcast %105 : vector<16x1xf32> to vector<16x16xf32>
    %107 = arith.subf %103, %106 : vector<16x16xf32>
    %108 = math.exp %107 : vector<16x16xf32>
    %cst_39 = arith.constant dense<0.000000e+00> : vector<16xf32>
    %109 = vector.multi_reduction <add>, %108, %cst_39 [1] : vector<16x16xf32> to vector<16xf32>
    %110 = vector.shape_cast %109 : vector<16xf32> to vector<16x1xf32>
    %cst_40 = arith.constant dense<0.000000e+00> : vector<16x8xf32>
    %111 = tpu.matmul %108, %101, %cst_40 {dimension_numbers = #tpu.dot_dimension_numbers<[1], [0], [0], [1], [0, 0, 1, 1], [], []>} : vector<16x16xf32>, vector<16x8xf32>, vector<16x8xf32> -> vector<16x8xf32>
    %112 = vector.broadcast %110 : vector<16x1xf32> to vector<16x8xf32>
    %113 = arith.divf %111, %112 : vector<16x8xf32>
    %114 = tpu.concatenate %68, %83, %98, %113 in 1 : vector<16x8xf32>, vector<16x8xf32>, vector<16x8xf32>, vector<16x8xf32> -> vector<16x32xf32>
    %c0_41 = arith.constant 0 : index
    %c0_42 = arith.constant 0 : index
    %115 = vector.load %arg7[%c0_41, %c0_42] : memref<32x32xf32, #tpu.memory_space<vmem>>, vector<32x32xf32>
    %cst_43 = arith.constant dense<0.000000e+00> : vector<16x32xf32>
    %116 = tpu.matmul %114, %115, %cst_43 {dimension_numbers = #tpu.dot_dimension_numbers<[1], [0], [0], [1], [0, 0, 1, 1], [], []>} : vector<16x32xf32>, vector<32x32xf32>, vector<16x32xf32> -> vector<16x32xf32>
    %c0_44 = arith.constant 0 : index
    %c0_45 = arith.constant 0 : index
    %117 = vector.load %arg8[%c0_44, %c0_45] : memref<1x32xf32, #tpu.memory_space<vmem>>, vector<1x32xf32>
    %118 = vector.broadcast %117 : vector<1x32xf32> to vector<16x32xf32>
    %119 = arith.addf %116, %118 : vector<16x32xf32>
    %120 = vector.shape_cast %119 : vector<16x32xf32> to vector<8x2x32xf32>
    %c0_46 = arith.constant 0 : index
    %c0_47 = arith.constant 0 : index
    %c0_48 = arith.constant 0 : index
    %121 = vector.load %arg9[%c0_46, %c0_47, %c0_48] : memref<8x2x32xf32, #tpu.memory_space<vmem>>, vector<8x2x32xf32>
    tpu.vector_store %arg9[%c0_46, %c0_47, %c0_48], %120 {strides = array<i32>} : memref<8x2x32xf32, #tpu.memory_space<vmem>>, vector<8x2x32xf32>,
    return
  }
  func.func @transform_0(%arg0: i32) -> (i32, i32, i32) {
    %c0_i32 = arith.constant 0 : i32
    %c0_i32_0 = arith.constant 0 : i32
    %c0_i32_1 = arith.constant 0 : i32
    return %c0_i32, %arg0, %c0_i32_0 : i32, i32, i32
  }
  func.func @transform_1(%arg0: i32) -> (i32, i32, i32) {
    %c0_i32 = arith.constant 0 : i32
    %c0_i32_0 = arith.constant 0 : i32
    %c0_i32_1 = arith.constant 0 : i32
    return %c0_i32, %arg0, %c0_i32_0 : i32, i32, i32
  }
  func.func @transform_2(%arg0: i32) -> (i32, i32) {
    %c0_i32 = arith.constant 0 : i32
    %c0_i32_0 = arith.constant 0 : i32
    %c0_i32_1 = arith.constant 0 : i32
    return %c0_i32, %c0_i32_0 : i32, i32
  }
  func.func @transform_3(%arg0: i32) -> (i32, i32) {
    %c0_i32 = arith.constant 0 : i32
    %c0_i32_0 = arith.constant 0 : i32
    %c0_i32_1 = arith.constant 0 : i32
    return %c0_i32, %c0_i32_0 : i32, i32
  }
  func.func @transform_4(%arg0: i32) -> (i32, i32) {
    %c0_i32 = arith.constant 0 : i32
    %c0_i32_0 = arith.constant 0 : i32
    %c0_i32_1 = arith.constant 0 : i32
    return %c0_i32, %c0_i32_0 : i32, i32
  }
  func.func @transform_5(%arg0: i32) -> (i32, i32) {
    %c0_i32 = arith.constant 0 : i32
    %c0_i32_0 = arith.constant 0 : i32
    %c0_i32_1 = arith.constant 0 : i32
    return %c0_i32, %c0_i32_0 : i32, i32
  }
  func.func @transform_6(%arg0: i32) -> (i32, i32) {
    %c0_i32 = arith.constant 0 : i32
    %c0_i32_0 = arith.constant 0 : i32
    %c0_i32_1 = arith.constant 0 : i32
    return %c0_i32, %c0_i32_0 : i32, i32
  }
  func.func @transform_7(%arg0: i32) -> (i32, i32) {
    %c0_i32 = arith.constant 0 : i32
    %c0_i32_0 = arith.constant 0 : i32
    %c0_i32_1 = arith.constant 0 : i32
    return %c0_i32, %c0_i32_0 : i32, i32
  }
  func.func @transform_8(%arg0: i32) -> (i32, i32, i32) {
    %c0_i32 = arith.constant 0 : i32
    %c0_i32_0 = arith.constant 0 : i32
    %c0_i32_1 = arith.constant 0 : i32
    return %c0_i32, %arg0, %c0_i32_0 : i32, i32, i32
  }
}

</mosaic_0001>

<bundles_post_ra>
// kernel: tpu_custom_call.1
= control target key start
LH: loop header
LB: loop body
LE: loop exit
PB: predicated region body
PF: predicated region fallthrough
CT: control target
= control target key end

     0   :  { %13 = vsyncpa [#allocation3], 0  ;;  %s2197_s0 = inlined_call_operand.hbm [shape: f32[8,2,32], index: 0, kind: input, shape index: {}]   ;;  %s2198_s1 = inlined_call_operand.hbm [shape: f32[8,2,32], index: 1, kind: input, shape index: {}]   ;;  %s2199_s2 = inlined_call_operand.hbm [shape: f32[32,32], index: 2, kind: input, shape index: {}]   ;;  %s2200_s3 = inlined_call_operand.hbm [shape: f32[32,64], index: 3, kind: input, shape index: {}]   ;;  %s2201_s4 = inlined_call_operand.vmem [shape: f32[1,32], index: 4, kind: input, shape index: {}]   ;;  %s2202_s5 = inlined_call_operand.vmem [shape: f32[1,64], index: 5, kind: input, shape index: {}]   ;;  %s2203_s6 = inlined_call_operand.hbm [shape: f32[32,32], index: 6, kind: input, shape index: {}]   ;;  %s2204_s7 = inlined_call_operand.vmem [shape: f32[1,32], index: 7, kind: input, shape index: {}]   ;;  %s2205_s8 = inlined_call_operand.hbm [shape: f32[8,2,32], index: 8, kind: output, shape index: {}]  }
   0x1   :  { %14 = vsyncpa [#allocation6], 0 }
   0x2   :  { %15 = vsyncpa [#allocation9], 0 }
   0x3   :  { %16 = vsyncpa [#allocation4], 0  ;;  %s1881_s27 = smov [#allocation5]   ;;  %s1741_s9 = scalar_lea.hbm %s2198_s1, 256 }
   0x4   :  { %s34_s28 = sshll.u32 %s1881_s27, 4  ;;  %p1742_p0 = scmp.ne.s32.totalorder %s2198_s1, %s1741_s9  ;;  %s35_s28 = int_to_ptr.vmem [resolvable:$true] %s34_s28 }
   0x5   :  { %p1745_p1 = scmp.lt.u32.totalorder %s1741_s9, %s2198_s1 }
   0x7   :  { %p1747_p2 = pnand %p1745_p1, %p1742_p0 }
   0x9   :  { %1750 = shalt.err (!%p1747_p2)
}
   0xa   :  { %s1751_s14 = scalar_lea.vmem %s35_s28, 256  ;;  %p1756_p4 = scmp.lt.s32.totalorder %s35_s28, %s35_s28 }
   0xb   :  { %p1752_p3 = scmp.ne.s32.totalorder %s35_s28, %s1751_s14  ;;  %p1757_p5 = scmp.lt.s32.totalorder %s1751_s14, %s1751_s14 }
   0xd   :  { %p1758_p6 = por %p1757_p5, %p1756_p4 }
   0xf   :  { %p1759_p7 = pnand %p1758_p6, %p1752_p3 }
  0x11   :  { %1762 = shalt.err (!%p1759_p7)
}
  0x12   :  { %s1882_s15 = smov 32   ;;  %s1883_s16 = smov 2  }
  0x13   :  { %40 = dma.hbm_to_vmem [thread:$0]  %s2198_s1, 256, %s35_s28, [#allocation6], %s1882_s15, %s1882_s15, %s1883_s16  }
  0x14   :  { %s1884_s19 = smov [#allocation8]   ;;  %s1885_s21 = smov [#allocation2]  }
  0x15   :  { %s58_s20 = sshll.u32 %s1884_s19, 4  ;;  %s22_s22 = sshll.u32 %s1885_s21, 4  ;;  %s59_s20 = int_to_ptr.vmem [resolvable:$true] %s58_s20  ;;  %s23_s22 = int_to_ptr.vmem [resolvable:$true] %s22_s22 }
  0x16   :  { %s1763_s25 = scalar_lea.hbm %s2200_s3, 512 }
  0x17   :  { %p1764_p8 = scmp.ne.s32.totalorder %s2200_s3, %s1763_s25  ;;  %p1767_p9 = scmp.lt.u32.totalorder %s1763_s25, %s2200_s3 }
  0x19   :  { %p1769_p10 = pnand %p1767_p9, %p1764_p8 }
  0x1b   :  { %1772 = shalt.err (!%p1769_p10)
}
  0x1c   :  { %s1773_s1 = scalar_lea.vmem %s59_s20, 512  ;;  %p1778_p12 = scmp.lt.s32.totalorder %s59_s20, %s59_s20 }
  0x1d   :  { %p1774_p11 = scmp.ne.s32.totalorder %s59_s20, %s1773_s1  ;;  %p1779_p13 = scmp.lt.s32.totalorder %s1773_s1, %s1773_s1 }
  0x1f   :  { %p1780_p0 = por %p1779_p13, %p1778_p12 }
  0x21   :  { %p1781_p1 = pnand %p1780_p0, %p1774_p11 }
  0x23   :  { %1784 = shalt.err (!%p1781_p1)
}
  0x24   :  { %s1886_s28 = smov 128   ;;  %s1887_s9 = smov 8  }
  0x25   :  { %64 = dma.hbm_to_vmem [thread:$0]  %s2200_s3, 512, %s59_s20, [#allocation9], %s1886_s28, %s1886_s28, %s1887_s9  }
  0x26   :  { %s1785_s14 = scalar_lea.hbm %s2197_s0, 256 }
  0x27   :  { %p1786_p2 = scmp.ne.s32.totalorder %s2197_s0, %s1785_s14  ;;  %p1789_p3 = scmp.lt.u32.totalorder %s1785_s14, %s2197_s0 }
  0x29   :  { %p1791_p4 = pnand %p1789_p3, %p1786_p2 }
  0x2b   :  { %1794 = shalt.err (!%p1791_p4)
}
  0x2c   :  { %s1795_s23 = scalar_lea.vmem %s23_s22, 256  ;;  %p1800_p6 = scmp.lt.s32.totalorder %s23_s22, %s23_s22 }
  0x2d   :  { %p1796_p5 = scmp.ne.s32.totalorder %s23_s22, %s1795_s23  ;;  %p1801_p7 = scmp.lt.s32.totalorder %s1795_s23, %s1795_s23 }
  0x2f   :  { %p1802_p8 = por %p1801_p7, %p1800_p6 }
  0x31   :  { %p1803_p9 = pnand %p1802_p8, %p1796_p5 }
  0x33   :  { %1806 = shalt.err (!%p1803_p9)
}
  0x34   :  { %28 = dma.hbm_to_vmem [thread:$0]  %s2197_s0, 256, %s23_s22, [#allocation3], %s1882_s15, %s1882_s15, %s1883_s16  }
  0x35   :  { %s1888_s24 = smov [#allocation7]   ;;  %s1889_s26 = smov [#allocation10]  }
  0x36   :  { %s46_s25 = sshll.u32 %s1888_s24, 4  ;;  %s74_s27 = sshll.u32 %s1889_s26, 4  ;;  %s47_s25 = int_to_ptr.vmem [resolvable:$true] %s46_s25  ;;  %s75_s27 = int_to_ptr.vmem [resolvable:$true] %s74_s27 }
  0x37   :  { %s1807_s1 = scalar_lea.hbm %s2199_s2, 512 }
  0x38   :  { %p1808_p10 = scmp.ne.s32.totalorder %s2199_s2, %s1807_s1  ;;  %p1811_p11 = scmp.lt.u32.totalorder %s1807_s1, %s2199_s2 }
  0x3a   :  { %p1813_p12 = pnand %p1811_p11, %p1808_p10 }
  0x3c   :  { %1816 = shalt.err (!%p1813_p12)
}
  0x3d   :  { %s1817_s0 = scalar_lea.vmem %s47_s25, 512  ;;  %p1822_p0 = scmp.lt.s32.totalorder %s47_s25, %s47_s25 }
  0x3e   :  { %p1818_p13 = scmp.ne.s32.totalorder %s47_s25, %s1817_s0  ;;  %p1823_p1 = scmp.lt.s32.totalorder %s1817_s0, %s1817_s0 }
  0x40   :  { %p1824_p2 = por %p1823_p1, %p1822_p0 }
  0x42   :  { %p1825_p3 = pnand %p1824_p2, %p1818_p13 }
  0x44   :  { %1828 = shalt.err (!%p1825_p3)
}
  0x45   :  { %52 = dma.hbm_to_vmem [thread:$0]  %s2199_s2, 512, %s47_s25, [#allocation6], %s1886_s28, %s1886_s28, %s1887_s9  }
  0x46   :  { %s1829_s19 = scalar_lea.hbm %s2203_s6, 512 }
  0x47   :  { %p1830_p4 = scmp.ne.s32.totalorder %s2203_s6, %s1829_s19  ;;  %p1833_p5 = scmp.lt.u32.totalorder %s1829_s19, %s2203_s6 }
  0x49   :  { %p1835_p6 = pnand %p1833_p5, %p1830_p4 }
  0x4b   :  { %1838 = shalt.err (!%p1835_p6)
}
  0x4c   :  { %s1839_s24 = scalar_lea.vmem %s75_s27, 512  ;;  %p1844_p8 = scmp.lt.s32.totalorder %s75_s27, %s75_s27 }
  0x4d   :  { %p1840_p7 = scmp.ne.s32.totalorder %s75_s27, %s1839_s24  ;;  %p1845_p9 = scmp.lt.s32.totalorder %s1839_s24, %s1839_s24 }
  0x4f   :  { %p1846_p10 = por %p1845_p9, %p1844_p8 }
  0x51   :  { %p1847_p11 = pnand %p1846_p10, %p1840_p7 }
  0x53   :  { %1850 = shalt.err (!%p1847_p11)
}
  0x54   :  { %80 = dma.hbm_to_vmem [thread:$0]  %s2203_s6, 512, %s75_s27, [#allocation9], %s1886_s28, %s1886_s28, %s1887_s9  }
  0x55   :  { %1873 = dma.done.wait [#allocation3], 256  }
  0x56   :  { %1874 = vsyncadd [#allocation3], 4294967040 }
  0x57   :  { %1875 = dma.done.wait [#allocation6], 768  }
  0x58   :  { %1876 = vsyncadd [#allocation6], 4294966528 }
  0x59   :  { %1877 = dma.done.wait [#allocation9], 1024  }
  0x5a   :  { %1878 = vsyncadd [#allocation9], 4294966272  ;;  %v138_v0 = vlaneseq  ;;  %v1890_v1 = vmov 1983009808   ;;  %v247_v5 = vld [vmem:[#allocation8] sm:$0xff]  ;;  %v248_v6 = vld [vmem:[#allocation8 + $0x8] sm:$0xff] }
  0x5b   :  { %v136_v2 = vunpack.c.l.s4 %v1890_v1  ;;  %v249_v7 = vld [vmem:[#allocation8 + $0x10] sm:$0xff]  ;;  %v1597_v9 = vpack.c.bf16 %v248_v6, %v247_v5  ;;  %v250_v10 = vld [vmem:[#allocation8 + $0x18] sm:$0xff]  ;;  %v114_v17 = vld [vmem:[#allocation7] sm:$0xff]  ;;  %vm167_vm0 = vcmask 261120   ;;  %vm424_vm1 = vcmask 64512   ;;  %s1893_s29 = smov 112  }
  0x5c   :  { %v2023_v4 = vshrl.u32 %v138_v0, 7  ;;  %v106_v11 = vld [vmem:[#allocation5] sm:$0x3]  ;;  %v107_v12 = vld [vmem:[#allocation5 + $0x2] sm:$0x3]  ;;  %v1601_v13 = vpack.c.bf16 %v250_v10, %v249_v7  ;;  %v115_v19 = vld [vmem:[#allocation7 + $0x8] sm:$0xff] }
  0x5d   :  { %v137_v3 = vunpack.c.0.s8 %v136_v2  ;;  %v108_v14 = vld [vmem:[#allocation5 + $0x4] sm:$0x3]  ;;  %v109_v15 = vld [vmem:[#allocation5 + $0x6] sm:$0x3]  ;;  %v266_v16 = vcombine.low %v106_v11, %v107_v12  ;;  %1598 = vmatprep.subr.bf16.mxu1 %v1597_v9  ;;  %v110_v20 = vld [vmem:[#allocation5 + $0x8] sm:$0x3]  ;;  %v1589_v23 = vpack.c.bf16 %v115_v19, %v114_v17 }
  0x5e   :  { %v267_v18 = vcombine.low %v108_v14, %v109_v15  ;;  %v111_v21 = vld [vmem:[#allocation5 + $0xa] sm:$0x3]  ;;  %1600 = vmatpush3.bf16.msra.mxu1 %v1597_v9  ;;  %v112_v24 = vld [vmem:[#allocation5 + $0xc] sm:$0x3]  ;;  %v113_v25 = vld [vmem:[#allocation5 + $0xe] sm:$0x3] }
  0x5f   :  { %v2026_v8 = vsub.s32 %v137_v3, %v2023_v4  ;;  %v283_v26 = vcombine.low %v110_v20, %v111_v21  ;;  %v116_v27 = vld [vmem:[#allocation7 + $0x10] sm:$0xff]  ;;  %1602 = vmatprep.subr.bf16.mxu1 %v1601_v13  ;;  %v284_v29 = vcombine.low %v112_v24, %v113_v25  ;;  %v117_v30 = vld [vmem:[#allocation7 + $0x18] sm:$0xff]  ;;  %v98_v31 = vld [vmem:[#allocation2] sm:$0x3]  ;;  %1590 = vmatprep.subr.bf16.mxu0 %v1589_v23  ;;  %s1894_s30 = smov 88   ;;  %v407_v21 = vand.u32 127, %v138_v0 }
  0x60   :  { %v99_v32 = vld [vmem:[#allocation2 + $0x2] sm:$0x3]  ;;  %v1593_v34 = vpack.c.bf16 %v117_v30, %v116_v27  ;;  %v100_v35 = vld [vmem:[#allocation2 + $0x4] sm:$0x3]  ;;  %v101_v36 = vld [vmem:[#allocation2 + $0x6] sm:$0x3]  ;;  %1592 = vmatpush3.bf16.msra.mxu0 %v1589_v23 }
  0x61   :  { %v274_v22 = vrot.slane %v266_v16, %v2026_v8  ;;  %v281_v28 = vrot.slane %v267_v18, %v2026_v8  ;;  %v291_v33 = vrot.slane %v283_v26, %v2026_v8  ;;  %v133_v37 = vcombine.low %v98_v31, %v99_v32  ;;  %v102_v38 = vld [vmem:[#allocation2 + $0x8] sm:$0x3]  ;;  %v103_v42 = vld [vmem:[#allocation2 + $0xa] sm:$0x3]  ;;  %v104_v43 = vld [vmem:[#allocation2 + $0xc] sm:$0x3] }
  0x62   :  { %v298_v40 = vrot.slane %v284_v29, %v2026_v8  ;;  %v134_v41 = vcombine.low %v100_v35, %v101_v36  ;;  %v105_v44 = vld [vmem:[#allocation2 + $0xe] sm:$0x3]  ;;  %1604 = vmatpush3.bf16.msra.mxu1 %v1601_v13  ;;  %1594 = vmatprep.subr.bf16.mxu0 %v1593_v34  ;;  %v150_v46 = vcombine.low %v102_v38, %v103_v42  ;;  %v1420_v54 = vld [vmem:[%s2202_s5] ss:$0 sm:$0xff]  ;;  %vm2048_vm2 = vmpackc.low %vm424_vm1, %vm424_vm1  ;;  %s1891_s5 = smov 96   ;;  %v412_v23 = vand.u32 1, %v407_v21 }
  0x63   :  { %v282_v39 = vcombine.low %v274_v22, %v281_v28  ;;  %v141_v45 = vrot.slane %v133_v37, %v2026_v8  ;;  %v151_v47 = vcombine.low %v104_v43, %v105_v44  ;;  %v1417_v59 = vld [vmem:[%s2201_s4] ss:$0 sm:$0xff]  ;;  %s1892_s4 = smov 120   ;;  %v381_v22 = vadd.s32 8, %v2023_v4  ;;  %s1896_s1 = smov 104  }
  0x64   :  { %v299_v48 = vcombine.low %v291_v33, %v298_v40  ;;  %v148_v49 = vrot.slane %v134_v41, %v2026_v8  ;;  %v158_v50 = vrot.slane %v150_v46, %v2026_v8  ;;  %1596 = vmatpush3.bf16.msra.mxu0 %v1593_v34  ;;  %v386_v24 = vand.u32 1, %v2023_v4  ;;  %s1897_s10 = smov 80   ;;  %s1898_s11 = smov 72  }
  0x65   :  { %1519 = vmatprep.mubr.msk.f32.mxu1 %vm167_vm0, %v282_v39  ;;  %v165_v51 = vrot.slane %v151_v47, %v2026_v8  ;;  %v393_v25 = vand.u32 1, %v381_v22  ;;  %v1895_v26 = vmov -1e+30   ;;  %vm512_vm5 = vcmask 130048   ;;  %s1899_s12 = smov 16   ;;  %s1901_s22 = smov [#allocation11]  }
  0x66   :  { %1520 = vmatmul.mubr.msk.f32.vlgmr.msra.gmra.mrb[0].mxu1 %vm167_vm0, %v299_v48  ;;  %v149_v52 = vcombine.low %v141_v45, %v148_v49  ;;  %vm420_vm3 = vcmp.eq.s32.totalorder %v386_v24, %v412_v23  ;;  %vm1250_vm6 = vcmask 195584   ;;  %vm1389_vm7 = vcmask 254976   ;;  %s1403_s14 = sshll.u32 %s1901_s22, 4  ;;  %s1404_s14 = int_to_ptr.vmem [resolvable:$true] %s1403_s14 }
  0x67   :  { %v166_v53 = vcombine.low %v158_v50, %v165_v51  ;;  %vm421_vm4 = vcmp.eq.s32.totalorder %v393_v25, %v412_v23  ;;  %v2086_v27 = vsel %vm420_vm3, 0.0, %v1895_v26  ;;  %p1856_p13 = scmp.lt.s32.totalorder %s1404_s14, %s1404_s14 }
  0x68   :  { %1508 = vmatprep.mubr.msk.f32.mxu0 %vm167_vm0, %v149_v52  ;;  %v2088_v29 = vsel %vm421_vm4, 0.0, %v1895_v26 }
  0x69   :  { %1509 = vmatmul.mubr.msk.f32.vlgmr.msra.gmra.mrb[0].mxu0 %vm167_vm0, %v166_v53 }
 0x139   :  { %v1521_v55 = vpop.f32.mrb[0].mxu1 }
 0x13a   :  { %v376_v56 = vadd.f32 %v1521_v55, %v1420_v54  ;;  %v370_v57 = vpop.f32.mrb[1].mxu1 }
 0x13b   :  { %v371_v58 = vadd.f32 %v1420_v54, %v370_v57 }
 0x13c   :  { %v1510_v61 = vpop.f32.mrb[0].mxu0 }
 0x13d   :  { %v2052_v62 = vpack.i.bf16 %v376_v56, %v371_v58  ;;  %v1605_v63 = vpack.c.bf16 %v376_v56, %v371_v58  ;;  %v238_v1 = vpop.f32.mrb[1].mxu0  ;;  %v2065_v3 = vadd.f32 %v1510_v61, %v1417_v59 }
 0x13e   :  { %v2054_v2 = vadd.f32 %v1417_v59, %v238_v1 }
 0x13f   :  { %1675 = vrot.lane.b32.xlu1 %v2052_v62, %s1891_s5  ;;  %1607 = vmatprep.subr.msk.bf16.mxu0 %vm2048_vm2, %v1605_v63 }
 0x140   :  { %1610 = vmatpush3.bf16.xpose.msk.msra.mxu0 %vm2048_vm2, %v1605_v63  ;;  %1526 = vmatprep.mubr.msk.f32.mxu0 %vm424_vm1, %v2054_v2 }
 0x143   :  { %1680 = vrot.lane.b32.xlu1 %v2052_v62, %s1892_s4 }
 0x147   :  { %1685 = vrot.lane.b32.xlu1 %v2052_v62, %s1893_s29  ;;  %1527 = vmatmul.mubr.msk.f32.vlgmr.msra.gmra.mrb[2].mxu0 %vm424_vm1, %v2065_v3 }
 0x14b   :  { %624 = vrot.lane.b32.xlu1 %v2065_v3, %s1892_s4 }
 0x14f   :  { %822 = vrot.lane.b32.xlu1 %v2054_v2, %s1893_s29 }
 0x153   :  { %824 = vrot.lane.b32.xlu1 %v2065_v3, %s1893_s29 }
 0x157   :  { %1690 = vrot.lane.b32.xlu1 %v2052_v62, %s1894_s30 }
 0x1b1   :  { %v1676_v5 = vpop.permute.xlu1 %1675 }
 0x1b2   :  { %v1678_v6 = vunpack.i.h.bf16 %v1676_v5  ;;  %v1677_v7 = vunpack.i.l.bf16 %v1676_v5 }
 0x1b4   :  { %v1611_v9 = vpack.c.bf16 %v1678_v6, %v1677_v7 }
 0x1b5   :  { %v1681_v10 = vpop.permute.xlu1 %1680 }
 0x1b6   :  { %v1683_v11 = vunpack.i.h.bf16 %v1681_v10  ;;  %v1682_v12 = vunpack.i.l.bf16 %v1681_v10  ;;  %1612 = vmatprep.subr.bf16.mxu1 %v1611_v9 }
 0x1b7   :  { %1614 = vmatpush3.bf16.msra.mxu1 %v1611_v9 }
 0x1b8   :  { %v1615_v13 = vpack.c.bf16 %v1683_v11, %v1682_v12 }
 0x1b9   :  { %v1686_v14 = vpop.permute.xlu1 %1685 }
 0x1ba   :  { %v1688_v15 = vunpack.i.h.bf16 %v1686_v14  ;;  %v1687_v16 = vunpack.i.l.bf16 %v1686_v14  ;;  %1617 = vmatprep.subr.msk.bf16.mxu1 %vm2048_vm2, %v1615_v13 }
 0x1bc   :  { %v1625_v17 = vpack.c.bf16 %v1688_v15, %v1687_v16 }
 0x1bd   :  { %v625_v18 = vpop.permute.xlu1 %624 }
 0x1be   :  { %1627 = vmatprep.subr.msk.bf16.mxu0 %vm2048_vm2, %v1625_v17 }
 0x1bf   :  { %1630 = vmatpush3.bf16.xpose.msk.msra.mxu0 %vm2048_vm2, %v1625_v17 }
 0x1c1   :  { %v823_v19 = vpop.permute.xlu1 %822 }
 0x1c2   :  { %1554 = vmatprep.mubr.msk.f32.mxu0 %vm424_vm1, %v823_v19 }
 0x1c5   :  { %v825_v20 = vpop.permute.xlu1 %824 }
 0x1c6   :  { %1555 = vmatmul.mubr.msk.f32.vlgmr.msra.gmra.mrb[4].mxu0 %vm424_vm1, %v825_v20 }
 0x1c9   :  { %v1691_v45 = vpop.permute.xlu1 %1690 }
 0x1ca   :  { %v1693_v47 = vunpack.i.h.bf16 %v1691_v45  ;;  %v1692_v48 = vunpack.i.l.bf16 %v1691_v45 }
 0x1cc   :  { %v1621_v50 = vpack.c.bf16 %v1693_v47, %v1692_v48 }
 0x21a   :  { %v1528_v28 = vpop.f32.mrb[2].mxu0 }
 0x21b   :  { %v503_v30 = vpop.f32.mrb[3].mxu0  ;;  %v509_v0 = vadd.f32 %v1528_v28, %v2088_v29 }
 0x21c   :  { %v504_v31 = vadd.f32 %v503_v30, %v2086_v27 }
 0x21d   :  { %v516_v4 = vsel %vm512_vm5, %v509_v0, -inf }
 0x21e   :  { %v513_v32 = vsel %vm512_vm5, %v504_v31, -inf }
 0x21f   :  { %514 = vmax.xlane.f32.xlu0 %v513_v32 }
 0x223   :  { %517 = vmax.xlane.f32.xlu0 %v516_v4 }
 0x239   :  { %622 = vrot.lane.b32.xlu0 %v2054_v2, %s1892_s4 }
 0x299   :  { %v1556_v33 = vpop.f32.mrb[4].mxu0 }
 0x29a   :  { %v910_v34 = vadd.f32 %v1556_v33, %v2088_v29  ;;  %v904_v35 = vpop.f32.mrb[5].mxu0 }
 0x29b   :  { %v905_v36 = vadd.f32 %v904_v35, %v2086_v27 }
 0x29c   :  { %v916_v37 = vsel %vm512_vm5, %v910_v34, -inf }
 0x29d   :  { %917 = vmax.xlane.f32.xlu0 %v916_v37  ;;  %v913_v38 = vsel %vm512_vm5, %v905_v36, -inf }
 0x29e   :  { %914 = vmax.xlane.f32.xlu1 %v913_v38 }
 0x2ac   :  { %v515_v39 = vpop.xlane.xlu0 %514 }
 0x2ad   :  { %v519_v40 = vsub.f32 %v504_v31, %v515_v39 }
 0x2af   :  { %v521_v41 = vmul.f32 1.442695, %v519_v40 }
 0x2b0   :  { %v518_v42 = vpop.xlane.xlu0 %517 }
 0x2b1   :  { %1709 = vpow2.f32 %v521_v41  ;;  %v520_v43 = vsub.f32 %v509_v0, %v518_v42 }
 0x2b3   :  { %v523_v44 = vmul.f32 1.442695, %v520_v43 }
 0x2b4   :  { %v623_v51 = vpop.permute.xlu0 %622 }
 0x2b5   :  { %1711 = vpow2.f32 %v523_v44 }
 0x2bb   :  { %v2100_v46 = vpop.eup %1709 }
 0x2bc   :  { %1533 = vmatprep.mubr.msk.f32.mxu1 %vm512_vm5, %v2100_v46 }
 0x2bf   :  { %v2104_v49 = vpop.eup %1711 }
 0x2c0   :  { %1534 = vmatmul.mubr.msk.f32.vlgmr.msra.gmra.mrb[2].mxu1 %vm512_vm5, %v2104_v49 }
 0x2c1   :  { %1620 = vmatpush3.bf16.xpose.msk.msra.mxu1 %vm2048_vm2, %v1615_v13  ;;  %1540 = vmatprep.mubr.msk.f32.mxu1 %vm424_vm1, %v623_v51 }
 0x2c2   :  { %1622 = vmatprep.subr.bf16.mxu1 %v1621_v50 }
 0x2c8   :  { %1541 = vmatmul.mubr.msk.f32.vlgmr.msra.gmra.mrb[4].mxu1 %vm424_vm1, %v625_v18 }
 0x2c9   :  { %1624 = vmatpush3.bf16.msra.mxu1 %v1621_v50 }
 0x32a   :  { %v918_v61 = vpop.xlane.xlu0 %917 }
 0x32b   :  { %v915_v63 = vpop.xlane.xlu1 %914  ;;  %v920_v10 = vsub.f32 %v910_v34, %v918_v61  ;;  %v528_v61 = vsel %vm512_vm5, %v2104_v49, 0.0 }
 0x32c   :  { %v919_v1 = vsub.f32 %v905_v36, %v915_v63 }
 0x32d   :  { %v923_v17 = vmul.f32 1.442695, %v920_v10  ;;  %v1253_v10 = vld [vmem:[#allocation10] sm:$0xff] }
 0x32e   :  { %v921_v12 = vmul.f32 1.442695, %v919_v1 }
 0x393   :  { %v2112_v52 = vpop.f32.mrb[2].mxu1 }
 0x394   :  { %v2114_v53 = vpop.f32.mrb[3].mxu1 }
 0x39b   :  { %v1542_v54 = vpop.f32.mrb[4].mxu1 }
 0x39c   :  { %v710_v55 = vadd.f32 %v1542_v54, %v2088_v29  ;;  %v704_v56 = vpop.f32.mrb[5].mxu1 }
 0x39d   :  { %v705_v57 = vadd.f32 %v704_v56, %v2086_v27 }
 0x39e   :  { %v716_v58 = vsel %vm512_vm5, %v710_v55, -inf }
 0x39f   :  { %717 = vmax.xlane.f32.xlu0 %v716_v58  ;;  %v713_v59 = vsel %vm512_vm5, %v705_v57, -inf }
 0x3a0   :  { %714 = vmax.xlane.f32.xlu1 %v713_v59  ;;  %v525_v59 = vsel %vm512_vm5, %v2100_v46, 0.0 }
 0x3b1   :  { %1700 = vrot.lane.b32.xlu1 %v2052_v62, %s1896_s1 }
 0x3b5   :  { %1695 = vrot.lane.b32.xlu0 %v2052_v62, %s1897_s10  ;;  %1022 = vrot.lane.b32.xlu1 %v2054_v2, %s1896_s1 }
 0x3b9   :  { %1024 = vrot.lane.b32.xlu0 %v2065_v3, %s1896_s1 }
 0x42c   :  { %v718_v5 = vpop.xlane.xlu0 %717 }
 0x42d   :  { %v720_v6 = vsub.f32 %v710_v55, %v718_v5  ;;  %v715_v7 = vpop.xlane.xlu1 %714 }
 0x42e   :  { %v719_v9 = vsub.f32 %v705_v57, %v715_v7 }
 0x42f   :  { %v723_v11 = vmul.f32 1.442695, %v720_v6 }
 0x430   :  { %v721_v13 = vmul.f32 1.442695, %v719_v9  ;;  %v1696_v14 = vpop.permute.xlu0 %1695 }
 0x431   :  { %v1698_v15 = vunpack.i.h.bf16 %v1696_v14  ;;  %v1697_v16 = vunpack.i.l.bf16 %v1696_v14  ;;  %v1701_v3 = vpop.permute.xlu1 %1700  ;;  %v1255_v14 = vld [vmem:[#allocation10 + $0x10] sm:$0xff] }
 0x432   :  { %1713 = vpow2.f32 %v721_v13  ;;  %v1703_v18 = vunpack.i.h.bf16 %v1701_v3  ;;  %v1702_v19 = vunpack.i.l.bf16 %v1701_v3 }
 0x433   :  { %1715 = vpow2.f32 %v723_v11  ;;  %v1631_v2 = vpack.c.bf16 %v1698_v15, %v1697_v16  ;;  %v1254_v11 = vld [vmem:[#allocation10 + $0x8] sm:$0xff]  ;;  %v1256_v15 = vld [vmem:[#allocation10 + $0x18] sm:$0xff] }
 0x434   :  { %1717 = vpow2.f32 %v921_v12  ;;  %v1635_v23 = vpack.c.bf16 %v1703_v18, %v1702_v19  ;;  %v1025_v26 = vpop.permute.xlu0 %1024  ;;  %v1645_v12 = vpack.c.bf16 %v1254_v11, %v1253_v10  ;;  %v1649_v16 = vpack.c.bf16 %v1256_v15, %v1255_v14 }
 0x435   :  { %1632 = vmatprep.subr.bf16.mxu1 %v1631_v2  ;;  %1719 = vpow2.f32 %v923_v17  ;;  %v1023_v25 = vpop.permute.xlu1 %1022 }
 0x43c   :  { %v1714_v20 = vpop.eup %1713 }
 0x43d   :  { %v1716_v21 = vpop.eup %1715  ;;  %1547 = vmatprep.mubr.msk.f32.mxu1 %vm512_vm5, %v1714_v20  ;;  %v725_v36 = vsel %vm512_vm5, %v1714_v20, 0.0 }
 0x43e   :  { %v1718_v22 = vpop.eup %1717  ;;  %1548 = vmatmul.mubr.msk.f32.vlgmr.msra.gmra.mrb[6].mxu1 %vm512_vm5, %v1716_v21  ;;  %v728_v37 = vsel %vm512_vm5, %v1716_v21, 0.0 }
 0x43f   :  { %1634 = vmatpush3.bf16.msra.mxu1 %v1631_v2  ;;  %1561 = vmatprep.mubr.msk.f32.mxu1 %vm512_vm5, %v1718_v22  ;;  %v1720_v24 = vpop.eup %1719  ;;  %v925_v38 = vsel %vm512_vm5, %v1718_v22, 0.0 }
 0x440   :  { %1637 = vmatprep.subr.msk.bf16.mxu1 %vm2048_vm2, %v1635_v23 }
 0x442   :  { %1562 = vmatmul.mubr.msk.f32.vlgmr.msra.gmra.mrb[8].mxu1 %vm512_vm5, %v1720_v24 }
 0x443   :  { %1568 = vmatprep.mubr.msk.f32.mxu1 %vm424_vm1, %v1023_v25 }
 0x448   :  { %1640 = vmatpush3.bf16.xpose.msk.msra.mxu1 %vm2048_vm2, %v1635_v23 }
 0x44f   :  { %1569 = vmatmul.mubr.msk.f32.vlgmr.msra.gmra.mrb[10].mxu1 %vm424_vm1, %v1025_v26 }
 0x511   :  { %v2134_v28 = vpop.f32.mrb[6].mxu1 }
 0x512   :  { %v809_v30 = vpop.f32.mrb[7].mxu1 }
 0x515   :  { %v1563_v31 = vpop.f32.mrb[8].mxu1 }
 0x516   :  { %v2136_v0 = vpop.f32.mrb[9].mxu1 }
 0x522   :  { %v1570_v32 = vpop.f32.mrb[10].mxu1 }
 0x523   :  { %v1110_v4 = vadd.f32 %v1570_v32, %v2088_v29  ;;  %v1104_v33 = vpop.f32.mrb[11].mxu1  ;;  %v928_v29 = vsel %vm512_vm5, %v1720_v24, 0.0 }
 0x524   :  { %v1105_v34 = vadd.f32 %v1104_v33, %v2086_v27 }
 0x525   :  { %v1116_v35 = vsel %vm512_vm5, %v1110_v4, -inf }
 0x526   :  { %1117 = vmax.xlane.f32.xlu0 %v1116_v35  ;;  %v1113_v60 = vsel %vm512_vm5, %v1105_v34, -inf }
 0x527   :  { %1114 = vmax.xlane.f32.xlu1 %v1113_v60 }
 0x52b   :  { %726 = vadd.xlane.f32.xlu1 %v725_v36 }
 0x52f   :  { %729 = vadd.xlane.f32.xlu1 %v728_v37 }
 0x533   :  { %926 = vadd.xlane.f32.xlu1 %v925_v38 }
 0x537   :  { %929 = vadd.xlane.f32.xlu1 %v928_v29 }
 0x53c   :  { %1705 = vrot.lane.b32.xlu0 %v2052_v62, %s1898_s11 }
 0x5b3   :  { %v1118_v27 = vpop.xlane.xlu0 %1117 }
 0x5b4   :  { %v1120_v39 = vsub.f32 %v1110_v4, %v1118_v27  ;;  %v1115_v40 = vpop.xlane.xlu1 %1114 }
 0x5b5   :  { %v1119_v41 = vsub.f32 %v1105_v34, %v1115_v40 }
 0x5b6   :  { %v1123_v42 = vmul.f32 1.442695, %v1120_v39 }
 0x5b7   :  { %v1121_v43 = vmul.f32 1.442695, %v1119_v41  ;;  %v1706_v44 = vpop.permute.xlu0 %1705 }
 0x5b8   :  { %1721 = vpow2.f32 %v1123_v42  ;;  %v1708_v45 = vunpack.i.h.bf16 %v1706_v44  ;;  %v1707_v47 = vunpack.i.l.bf16 %v1706_v44  ;;  %v727_v48 = vpop.xlane.xlu1 %726 }
 0x5b9   :  { %1723 = vpow2.f32 %v1121_v43 }
 0x5ba   :  { %v1641_v50 = vpack.c.bf16 %v1708_v45, %v1707_v47 }
 0x5bc   :  { %1642 = vmatprep.subr.bf16.mxu0 %v1641_v50  ;;  %v730_v51 = vpop.xlane.xlu1 %729 }
 0x5bd   :  { %1644 = vmatpush3.bf16.msra.mxu0 %v1641_v50 }
 0x5be   :  { %1646 = vmatprep.subr.bf16.mxu0 %v1645_v12 }
 0x5c0   :  { %v927_v55 = vpop.xlane.xlu1 %926 }
 0x5c2   :  { %v1722_v54 = vpop.eup %1721 }
 0x5c3   :  { %v1724_v56 = vpop.eup %1723  ;;  %v1128_v62 = vsel %vm512_vm5, %v1722_v54, 0.0 }
 0x5c4   :  { %1129 = vadd.xlane.f32.xlu0 %v1128_v62  ;;  %1575 = vmatprep.mubr.msk.f32.mxu0 %vm512_vm5, %v1724_v56  ;;  %v1125_v57 = vsel %vm512_vm5, %v1724_v56, 0.0  ;;  %v930_v58 = vpop.xlane.xlu1 %929 }
 0x5c5   :  { %1576 = vmatmul.mubr.msk.f32.vlgmr.msra.gmra.mrb[6].mxu0 %vm512_vm5, %v1722_v54  ;;  %1126 = vadd.xlane.f32.xlu1 %v1125_v57  ;;  %1725 = vrcp.f32 %v930_v58 }
 0x5c6   :  { %1727 = vrcp.f32 %v727_v48  ;;  %1648 = vmatpush3.bf16.msra.mxu0 %v1645_v12 }
 0x5c7   :  { %1729 = vrcp.f32 %v730_v51  ;;  %1650 = vmatprep.subr.bf16.mxu0 %v1649_v16 }
 0x5c8   :  { %1731 = vrcp.f32 %v927_v55 }
 0x5c9   :  { %526 = vadd.xlane.f32.xlu1 %v525_v59 }
 0x5ca   :  { %1652 = vmatpush3.bf16.msra.mxu0 %v1649_v16 }
 0x5cd   :  { %529 = vadd.xlane.f32.xlu1 %v528_v61 }
 0x5cf   :  { %v1726_v63 = vpop.eup %1725 }
 0x5d0   :  { %v1021_v1 = vmul.f32 %v1726_v63, %v1563_v31  ;;  %v1728_v5 = vpop.eup %1727 }
 0x5d1   :  { %v819_v6 = vmul.f32 %v1728_v5, %v809_v30  ;;  %v1730_v7 = vpop.eup %1729 }
 0x5d2   :  { %v821_v46 = vmul.f32 %v1730_v7, %v2134_v28  ;;  %v1732_v9 = vpop.eup %1731 }
 0x5d3   :  { %v1019_v49 = vmul.f32 %v1732_v9, %v2136_v0 }
 0x5da   :  { %1234 = vrot.lane.b32.xlu0 %v1021_v1, %s1899_s12 }
 0x5de   :  { %1224 = vrot.lane.b32.xlu1 %v819_v6, %s1887_s9 }
 0x5e2   :  { %1226 = vrot.lane.b32.xlu1 %v821_v46, %s1887_s9  ;;  %s1900_s9 = smov 24  }
 0x5e6   :  { %1232 = vrot.lane.b32.xlu1 %v1019_v49, %s1899_s12 }
 0x651   :  { %v1130_v17 = vpop.xlane.xlu0 %1129 }
 0x652   :  { %v1127_v13 = vpop.xlane.xlu1 %1126 }
 0x653   :  { %1733 = vrcp.f32 %v1127_v13 }
 0x654   :  { %1735 = vrcp.f32 %v1130_v17 }
 0x655   :  { %v1235_v60 = vpop.permute.xlu0 %1234 }
 0x656   :  { %v527_v22 = vpop.xlane.xlu1 %526 }
 0x657   :  { %1737 = vrcp.f32 %v527_v22 }
 0x65a   :  { %v530_v23 = vpop.xlane.xlu1 %529 }
 0x65b   :  { %1739 = vrcp.f32 %v530_v23 }
 0x65d   :  { %v1734_v3 = vpop.eup %1733 }
 0x65e   :  { %v1736_v20 = vpop.eup %1735  ;;  %v1225_v24 = vpop.permute.xlu1 %1224 }
 0x661   :  { %v1738_v26 = vpop.eup %1737 }
 0x662   :  { %v1227_v25 = vpop.permute.xlu1 %1226  ;;  %v619_v30 = vmul.f32 %v1738_v26, %v2114_v53 }
 0x664   :  { %v1246_v32 = vsel %vm424_vm1, %v619_v30, %v1225_v24 }
 0x665   :  { %v1740_v28 = vpop.eup %1739 }
 0x666   :  { %v1233_v31 = vpop.permute.xlu1 %1232  ;;  %v621_v0 = vmul.f32 %v1740_v28, %v2112_v52  ;;  %v1447_v52 = vld [vmem:[%s2204_s7] ss:$0 sm:$0xff]  ;;  %s1851_s7 = scalar_lea.vmem %s1404_s14, 256 }
 0x667   :  { %v1248_v4 = vsel %vm512_vm5, %v1246_v32, %v1233_v31  ;;  %p1852_p12 = scmp.ne.s32.totalorder %s1404_s14, %s1851_s7  ;;  %p1857_p0 = scmp.lt.s32.totalorder %s1851_s7, %s1851_s7 }
 0x668   :  { %v1247_v34 = vsel %vm424_vm1, %v621_v0, %v1227_v25 }
 0x669   :  { %v1249_v36 = vsel %vm512_vm5, %v1247_v34, %v1235_v60  ;;  %p1858_p1 = por %p1857_p0, %p1856_p13 }
 0x66b   :  { %p1859_p2 = pnand %p1858_p1, %p1852_p12 }
 0x698   :  { %v1577_v2 = vpop.f32.mrb[6].mxu0 }
 0x699   :  { %v1209_v18 = vpop.f32.mrb[7].mxu0  ;;  %v1221_v21 = vmul.f32 %v1736_v20, %v1577_v2 }
 0x69a   :  { %v1219_v19 = vmul.f32 %v1734_v3, %v1209_v18 }
 0x69c   :  { %1240 = vrot.lane.b32.xlu1 %v1219_v19, %s1900_s9 }
 0x6a0   :  { %1242 = vrot.lane.b32.xlu1 %v1221_v21, %s1900_s9 }
 0x70e   :  { %v1241_v33 = vpop.permute.xlu1 %1240 }
 0x70f   :  { %v1251_v35 = vsel %vm1250_vm6, %v1248_v4, %v1241_v33 }
 0x710   :  { %1586 = vmatprep.mubr.msk.f32.mxu0 %vm167_vm0, %v1251_v35 }
 0x712   :  { %v1243_v37 = vpop.permute.xlu1 %1242 }
 0x713   :  { %v1252_v38 = vsel %vm1250_vm6, %v1249_v36, %v1243_v37 }
 0x714   :  { %1587 = vmatmul.mubr.msk.f32.vlgmr.msra.gmra.mrb[8].mxu0 %vm167_vm0, %v1252_v38 }
 0x7e7   :  { %v1588_v53 = vpop.f32.mrb[8].mxu0 }
 0x7e8   :  { %v1342_v29 = vadd.f32 %v1588_v53, %v1447_v52  ;;  %v1336_v27 = vpop.f32.mrb[9].mxu0 }
 0x7e9   :  { %v1337_v39 = vadd.f32 %v1447_v52, %v1336_v27 }
 0x7ea   :  { %v1364_v40 = vcombine.high %v1342_v29, %v1342_v29  ;;  %v1371_v41 = vrot.slane %v1342_v29, %v2026_v8 }
 0x7eb   :  { %v1347_v42 = vcombine.high %v1337_v39, %v1337_v39  ;;  %v1354_v43 = vrot.slane %v1337_v39, %v2026_v8 }
 0x7ec   :  { %v1378_v44 = vrot.slane %v1364_v40, %v2026_v8  ;;  %v1379_v45 = vcombine.high %v1371_v41, %v1371_v41  ;;  %1394 = vst.msk [vmem:[#allocation11 + $0x8] sm:$0x3] %vm1389_vm7, %v1371_v41 }
 0x7ed   :  { %v1361_v47 = vrot.slane %v1347_v42, %v2026_v8  ;;  %v1362_v48 = vcombine.high %v1354_v43, %v1354_v43  ;;  %1390 = vst.msk [vmem:[#allocation11] sm:$0x3] %vm1389_vm7, %v1354_v43 }
 0x7ee   :  { %v1380_v50 = vcombine.high %v1378_v44, %v1378_v44  ;;  %1395 = vst.msk [vmem:[#allocation11 + $0xa] sm:$0x3] %vm1389_vm7, %v1379_v45  ;;  %1396 = vst.msk [vmem:[#allocation11 + $0xc] sm:$0x3] %vm1389_vm7, %v1378_v44 }
 0x7ef   :  { %v1363_v51 = vcombine.high %v1361_v47, %v1361_v47  ;;  %1391 = vst.msk [vmem:[#allocation11 + $0x2] sm:$0x3] %vm1389_vm7, %v1362_v48  ;;  %1392 = vst.msk [vmem:[#allocation11 + $0x4] sm:$0x3] %vm1389_vm7, %v1361_v47 }
 0x7f0   :  { %1397 = vst.msk [vmem:[#allocation11 + $0xe] sm:$0x3] %vm1389_vm7, %v1380_v50 }
 0x7f1   :  { %1393 = vst.msk [vmem:[#allocation11 + $0x6] sm:$0x3] %vm1389_vm7, %v1363_v51 }
 0x7f2   :  { %1862 = shalt.err (!%p1859_p2)
}
 0x7f3   :  { %s1863_s19 = scalar_lea.hbm %s2205_s8, 256 }
 0x7f4   :  { %p1864_p3 = scmp.ne.s32.totalorder %s2205_s8, %s1863_s19  ;;  %p1867_p4 = scmp.lt.u32.totalorder %s1863_s19, %s2205_s8 }
 0x7f6   :  { %p1869_p5 = pnand %p1867_p4, %p1864_p3 }
 0x7f8   :  { %1872 = shalt.err (!%p1869_p5)
}
 0x7f9   :  { %1409 = dma.vmem_to_hbm [thread:$0]  %s1404_s14, 256, %s2205_s8, [#allocation4], %s1882_s15, %s1882_s15, %s1883_s16  }
 0x7fa   :  { %1879 = dma.done.wait [#allocation4], 256  }
 0x7fb   :  { %1880 = vsyncadd [#allocation4], 4294967040 }
 0x7fc   :  { %1413 = vsyncpa [#allocation3], 1 }
 0x7fd   :  { %1414 = vsyncpa [#allocation6], 1 }
 0x7fe   :  { %1415 = vsyncpa [#allocation9], 1 }
 0x7ff   :  { %1416 = vsyncpa [#allocation4], 1 }

</bundles_post_ra>
